<compile_context>
chip_gen: v7x
topology: tpu7x:2x2x1
jax: 0.10.0
libtpu: 0.0.40
codegen_flags: <defaults>
</compile_context>

<pallas_src>
import jax
import jax.numpy as jnp
from jax.experimental import pallas as pl
from jax.experimental.pallas import tpu as pltpu


def head_dnn_kernel(x_ref, w1_ref, bias_ref, w2_ref, b2_ref, o_ref, acc_ref):
    """Grid: (batch tiles, fc1 reduction tiles). Axis 1 is the reduction."""
    k = pl.program_id(1)

    # init accumulator on first reduction step
    @pl.when(k == 0)
    def _():
        acc_ref[...] = jnp.zeros_like(acc_ref)

    # fc1 partial matmul: (tb, tk) bf16 @ (tk, H) bf16 accumulated in f32
    acc_ref[...] += jnp.dot(x_ref[...], w1_ref[...],
                            preferred_element_type=jnp.float32)

    # finalize on last reduction step: folded bias(BN) + LeakyReLU + fc2
    @pl.when(k == pl.num_programs(1) - 1)
    def _():
        h = acc_ref[...] + bias_ref[...]            # fc1 bias + BN (folded)
        h = jnp.where(h > 0, h, 0.01 * h)           # LeakyReLU(0.01)
        # dropout(p=0.15) is identity in eval mode
        # fc2 (H -> 1): VPU multiply + lane reduction (avoids an N=1 MXU matmul)
        out = jnp.sum(h * w2_ref[...], axis=-1, keepdims=True) + b2_ref[...]
        o_ref[...] = out.astype(o_ref.dtype)


def _round_up(a, m):
    return ((a + m - 1) // m) * m


def head_dnn_forward(x, params, *, tk=None, tb=None):
    """x: (B, frames, emb_w, emb_h) float32 -> (B, 1) float32."""
    B = x.shape[0]
    x_flat = x.reshape(B, -1)                       # == torch .view(B, -1)
    D = x_flat.shape[1]
    H = params["w1"].shape[1]                       # 256

    # ---- Fold BatchNorm (running stats + affine) and fc1 bias in the wrapper.
    # (x@w1 + b1)*scale + shift == x @ (w1*scale) + (b1*scale + shift)
    eps = 1e-5
    scale = params["gamma"] / jnp.sqrt(params["run_var"] + eps)
    shift = params["beta"] - params["run_mean"] * scale
    w1_folded = (params["w1"] * scale[None, :]).astype(jnp.bfloat16)
    bias = (params["b1"] * scale + shift).reshape(1, H).astype(jnp.float32)
    w2_row = params["w2"].reshape(1, H).astype(jnp.float32)
    b2 = params["b2"].reshape(1, 1).astype(jnp.float32)

    # x streamed as bf16 (halves activation HBM traffic; MXU accumulates f32)
    x_bf = x_flat.astype(jnp.bfloat16)

    # ---- Tile selection.
    # Reduction tile: largest power-of-two <= 2048 that divides D.
    if tk is None:
        tk = 128
        while tk < 2048 and D % (tk * 2) == 0:
            tk *= 2
        tk = min(tk, D)
    assert D % tk == 0, "reduction dim must be a multiple of tk"

    # Batch tile: pad batch to a sublane multiple; cap tile at 128 rows.
    if tb is None:
        tb = min(_round_up(B, 8), 128)
    B_pad = _round_up(B, tb)
    if B_pad != B:
        x_bf = jnp.pad(x_bf, ((0, B_pad - B), (0, 0)))

    # ---- Explicit VMEM budget (double-buffered streams + accumulator),
    # capped at 48 MiB so it is safe on v7x (64 MiB physical VMEM) too.
    x_tile_bytes = tb * tk * 2
    w1_tile_bytes = tk * H * 2
    acc_bytes = tb * H * 4
    small_bytes = (3 * H + 2) * 4
    need = 2 * (x_tile_bytes + w1_tile_bytes) + acc_bytes + small_bytes
    vmem_limit = int(min(max(2 * need, 16 << 20), 48 << 20))

    grid = (B_pad // tb, D // tk)

    out = pl.pallas_call(
        head_dnn_kernel,
        out_shape=jax.ShapeDtypeStruct((B_pad, 1), jnp.float32),
        grid_spec=pltpu.PrefetchScalarGridSpec(
            num_scalar_prefetch=0,
            grid=grid,
            in_specs=[
                pl.BlockSpec((tb, tk), lambda b, k: (b, k)),   # x tile (bf16)
                pl.BlockSpec((tk, H), lambda b, k: (k, 0)),    # folded W1 tile (bf16)
                pl.BlockSpec((1, H), lambda b, k: (0, 0)),     # folded bias (f32)
                pl.BlockSpec((1, H), lambda b, k: (0, 0)),     # W2 as a row (f32)
                pl.BlockSpec((1, 1), lambda b, k: (0, 0)),     # b2
            ],
            out_specs=pl.BlockSpec((tb, 1), lambda b, k: (b, 0)),
            scratch_shapes=[pltpu.VMEM((tb, H), jnp.float32)],
        ),
        compiler_params=pltpu.CompilerParams(
            dimension_semantics=("parallel", "arbitrary"),
            vmem_limit_bytes=vmem_limit),
    )(x_bf, w1_folded, bias, w2_row, b2)

    return out[:B]                                  # drop padded batch rows


def head_dnn_reference(x, params):
    """Pure-JAX f32 reference for correctness checking."""
    B = x.shape[0]
    xf = x.reshape(B, -1)
    h = xf @ params["w1"] + params["b1"]
    eps = 1e-5
    h = (h - params["run_mean"]) / jnp.sqrt(params["run_var"] + eps)
    h = h * params["gamma"] + params["beta"]
    h = jnp.where(h > 0, h, 0.01 * h)
    return h @ params["w2"] + params["b2"]


def make_params(key, D, H=256):
    """Deterministic parameter init (shapes match nn.Linear / nn.BatchNorm1d)."""
    k1, k2, k3, k4, k5 = jax.random.split(key, 5)
    # nn.Linear stores weight as (out, in); we keep the transposed (in, out)
    # layout so the kernel does x @ W directly.
    w1 = jax.random.normal(k1, (D, H), jnp.float32) * (1.0 / jnp.sqrt(D))
    b1 = jax.random.normal(k2, (H,), jnp.float32) * 0.01
    w2 = jax.random.normal(k3, (H, 1), jnp.float32) * (1.0 / jnp.sqrt(H))
    b2 = jax.random.normal(k4, (1,), jnp.float32) * 0.01
    # BatchNorm1d(256): affine params + running stats (perturbed from the
    # PyTorch defaults so the BN math is actually exercised).
    gamma = 1.0 + 0.1 * jax.random.normal(k5, (H,), jnp.float32)
    beta = jnp.linspace(-0.05, 0.05, H, dtype=jnp.float32)
    run_mean = jnp.linspace(-0.1, 0.1, H, dtype=jnp.float32)
    run_var = jnp.ones((H,), jnp.float32) * 1.2
    return dict(w1=w1, b1=b1, w2=w2, b2=b2, gamma=gamma, beta=beta,
                run_mean=run_mean, run_var=run_var)


if __name__ == "__main__":
    # Small shapes consistent with the module: (batch, frames, emb_w, emb_h).
    B, frames, emb_w, emb_h = 8, 4, 512, 1       # D = 4*512*1 = 2048
    D = frames * emb_w * emb_h

    key = jax.random.PRNGKey(0)
    kx, kp = jax.random.split(key)
    x = jax.random.normal(kx, (B, frames, emb_w, emb_h), jnp.float32)
    params = make_params(kp, D)

    # tk=1024 -> 2 reduction steps, exercises the init/finalize accumulator path.
    out = head_dnn_forward(x, params, tk=1024)
    out = jax.block_until_ready(out)

    ref = head_dnn_reference(x, params)
    assert out.shape == (B, 1), out.shape
    # bf16 input/weight streaming -> compare against the f32 reference with a
    # correspondingly loose tolerance.
    err = jnp.max(jnp.abs(out - ref))
    assert jnp.all(jnp.abs(out - ref) <= 5e-2 + 5e-2 * jnp.abs(ref)), (
        f"max abs err {err}")

    print("KERNEL_OK")
</pallas_src>

<mosaic_0001>
module attributes {stable_mosaic.version = 11 : i64} {
  func.func @head_dnn_kernel(%arg0: i32, %arg1: i32, %arg2: memref<8x1024xbf16, #tpu.memory_space<vmem>>, %arg3: memref<1024x256xbf16, #tpu.memory_space<vmem>>, %arg4: memref<1x256xf32, #tpu.memory_space<vmem>>, %arg5: memref<1x256xf32, #tpu.memory_space<vmem>>, %arg6: memref<1x1xf32, #tpu.memory_space<vmem>>, %arg7: memref<8x1xf32, #tpu.memory_space<vmem>>, %arg8: memref<8x256xf32, #tpu.memory_space<vmem>>) attributes {dimension_semantics = [#tpu.dimension_semantics<parallel>, #tpu.dimension_semantics<arbitrary>], iteration_bounds = array<i64: 1, 2>, scalar_prefetch = 0 : i64, scratch_operands = 1 : i64, tpu.core_type = #tpu.core_type<tc>, window_params = [{transform_indices = @transform_0, window_bounds = array<i64: 8, 1024>}, {transform_indices = @transform_1, window_bounds = array<i64: 1024, 256>}, {pipeline_mode = #tpu.pipeline_mode<synchronous>, transform_indices = @transform_2, window_bounds = array<i64: 1, 256>}, {pipeline_mode = #tpu.pipeline_mode<synchronous>, transform_indices = @transform_3, window_bounds = array<i64: 1, 256>}, {pipeline_mode = #tpu.pipeline_mode<synchronous>, transform_indices = @transform_4, window_bounds = array<i64: 1, 1>}, {transform_indices = @transform_5, window_bounds = array<i64: 8, 1>}]} {
    %c0_i32 = arith.constant 0 : i32
    %0 = arith.cmpi eq, %arg1, %c0_i32 : i32
    %1 = arith.extui %0 : i1 to i32
    %c0_i32_0 = arith.constant 0 : i32
    %2 = arith.cmpi ne, %1, %c0_i32_0 : i32
    scf.if %2 {
      %cst_9 = arith.constant 0.000000e+00 : f32
      %12 = vector.broadcast %cst_9 : f32 to vector<8x256xf32>
      %c0_10 = arith.constant 0 : index
      %c0_11 = arith.constant 0 : index
      %13 = vector.load %arg8[%c0_10, %c0_11] : memref<8x256xf32, #tpu.memory_space<vmem>>, vector<8x256xf32>
      tpu.vector_store %arg8[%c0_10, %c0_11], %12 {strides = array<i32>} : memref<8x256xf32, #tpu.memory_space<vmem>>, vector<8x256xf32>,
    } else {
    }
    %c0 = arith.constant 0 : index
    %c0_1 = arith.constant 0 : index
    %3 = vector.load %arg8[%c0, %c0_1] : memref<8x256xf32, #tpu.memory_space<vmem>>, vector<8x256xf32>
    %c0_2 = arith.constant 0 : index
    %c0_3 = arith.constant 0 : index
    %4 = vector.load %arg2[%c0_2, %c0_3] : memref<8x1024xbf16, #tpu.memory_space<vmem>>, vector<8x1024xbf16>
    %c0_4 = arith.constant 0 : index
    %c0_5 = arith.constant 0 : index
    %5 = vector.load %arg3[%c0_4, %c0_5] : memref<1024x256xbf16, #tpu.memory_space<vmem>>, vector<1024x256xbf16>
    %cst = arith.constant dense<0.000000e+00> : vector<8x256xf32>
    %6 = tpu.matmul %4, %5, %cst {dimension_numbers = #tpu.dot_dimension_numbers<[1], [0], [0], [1], [0, 0, 1, 1], [], []>} : vector<8x1024xbf16>, vector<1024x256xbf16>, vector<8x256xf32> -> vector<8x256xf32>
    %7 = arith.addf %3, %6 : vector<8x256xf32>
    %c0_6 = arith.constant 0 : index
    %c0_7 = arith.constant 0 : index
    %8 = vector.load %arg8[%c0_6, %c0_7] : memref<8x256xf32, #tpu.memory_space<vmem>>, vector<8x256xf32>
    tpu.vector_store %arg8[%c0_6, %c0_7], %7 {strides = array<i32>} : memref<8x256xf32, #tpu.memory_space<vmem>>, vector<8x256xf32>,
    %c1_i32 = arith.constant 1 : i32
    %9 = arith.cmpi eq, %arg1, %c1_i32 : i32
    %10 = arith.extui %9 : i1 to i32
    %c0_i32_8 = arith.constant 0 : i32
    %11 = arith.cmpi ne, %10, %c0_i32_8 : i32
    scf.if %11 {
      %c0_9 = arith.constant 0 : index
      %c0_10 = arith.constant 0 : index
      %12 = vector.load %arg8[%c0_9, %c0_10] : memref<8x256xf32, #tpu.memory_space<vmem>>, vector<8x256xf32>
      %c0_11 = arith.constant 0 : index
      %c0_12 = arith.constant 0 : index
      %13 = vector.load %arg4[%c0_11, %c0_12] : memref<1x256xf32, #tpu.memory_space<vmem>>, vector<1x256xf32>
      %14 = vector.broadcast %13 : vector<1x256xf32> to vector<8x256xf32>
      %15 = arith.addf %12, %14 : vector<8x256xf32>
      %cst_13 = arith.constant 0.000000e+00 : f32
      %16 = vector.broadcast %cst_13 : f32 to vector<8x256xf32>
      %17 = arith.cmpf ogt, %15, %16 : vector<8x256xf32>
      %cst_14 = arith.constant 0.00999999977 : f32
      %18 = vector.broadcast %cst_14 : f32 to vector<8x256xf32>
      %19 = arith.mulf %18, %15 : vector<8x256xf32>
      %20 = arith.select %17, %15, %19 : vector<8x256xi1>, vector<8x256xf32>
      %c0_15 = arith.constant 0 : index
      %c0_16 = arith.constant 0 : index
      %21 = vector.load %arg5[%c0_15, %c0_16] : memref<1x256xf32, #tpu.memory_space<vmem>>, vector<1x256xf32>
      %22 = vector.broadcast %21 : vector<1x256xf32> to vector<8x256xf32>
      %23 = arith.mulf %20, %22 : vector<8x256xf32>
      %cst_17 = arith.constant dense<0.000000e+00> : vector<8xf32>
      %24 = vector.multi_reduction <add>, %23, %cst_17 [1] : vector<8x256xf32> to vector<8xf32>
      %25 = vector.shape_cast %24 : vector<8xf32> to vector<8x1xf32>
      %c0_18 = arith.constant 0 : index
      %c0_19 = arith.constant 0 : index
      %26 = vector.load %arg6[%c0_18, %c0_19] : memref<1x1xf32, #tpu.memory_space<vmem>>, vector<1x1xf32>
      %27 = vector.broadcast %26 : vector<1x1xf32> to vector<8x1xf32>
      %28 = arith.addf %25, %27 : vector<8x1xf32>
      %c0_20 = arith.constant 0 : index
      %c0_21 = arith.constant 0 : index
      %29 = vector.load %arg7[%c0_20, %c0_21] : memref<8x1xf32, #tpu.memory_space<vmem>>, vector<8x1xf32>
      tpu.vector_store %arg7[%c0_20, %c0_21], %28 {strides = array<i32>} : memref<8x1xf32, #tpu.memory_space<vmem>>, vector<8x1xf32>,
    } else {
    }
    return
  }
  func.func @transform_0(%arg0: i32, %arg1: i32) -> (i32, i32) {
    %c0_i32 = arith.constant 0 : i32
    return %arg0, %arg1 : i32, i32
  }
  func.func @transform_1(%arg0: i32, %arg1: i32) -> (i32, i32) {
    %c0_i32 = arith.constant 0 : i32
    %c0_i32_0 = arith.constant 0 : i32
    return %arg1, %c0_i32 : i32, i32
  }
  func.func @transform_2(%arg0: i32, %arg1: i32) -> (i32, i32) {
    %c0_i32 = arith.constant 0 : i32
    %c0_i32_0 = arith.constant 0 : i32
    %c0_i32_1 = arith.constant 0 : i32
    return %c0_i32, %c0_i32_0 : i32, i32
  }
  func.func @transform_3(%arg0: i32, %arg1: i32) -> (i32, i32) {
    %c0_i32 = arith.constant 0 : i32
    %c0_i32_0 = arith.constant 0 : i32
    %c0_i32_1 = arith.constant 0 : i32
    return %c0_i32, %c0_i32_0 : i32, i32
  }
  func.func @transform_4(%arg0: i32, %arg1: i32) -> (i32, i32) {
    %c0_i32 = arith.constant 0 : i32
    %c0_i32_0 = arith.constant 0 : i32
    %c0_i32_1 = arith.constant 0 : i32
    return %c0_i32, %c0_i32_0 : i32, i32
  }
  func.func @transform_5(%arg0: i32, %arg1: i32) -> (i32, i32) {
    %c0_i32 = arith.constant 0 : i32
    %c0_i32_0 = arith.constant 0 : i32
    return %arg0, %c0_i32 : i32, i32
  }
}

</mosaic_0001>

<bundles_post_ra>
// kernel: tpu_custom_call.1
= control target key start
LH: loop header
LB: loop body
LE: loop exit
PB: predicated region body
PF: predicated region fallthrough
CT: control target
= control target key end

     0   :  { %s2330_s0 = inlined_call_operand.hbm [shape: bf16[8,2048], index: 0, kind: input, shape index: {}]   ;;  %s2331_s1 = inlined_call_operand.hbm [shape: bf16[2048,256], index: 1, kind: input, shape index: {}]   ;;  %s2332_s2 = inlined_call_operand.vmem [shape: f32[1,256], index: 2, kind: input, shape index: {}]   ;;  %s2333_s3 = inlined_call_operand.vmem [shape: f32[1,256], index: 3, kind: input, shape index: {}]   ;;  %s2334_s4 = inlined_call_operand.<no memory space> [shape: f32[1,1], index: 4, kind: input, shape index: {}]   ;;  %s2335_s5 = inlined_call_operand.vmem [shape: f32[8,1], index: 5, kind: output, shape index: {}]  }
   0x1   :  { %v10_v0 = vstv %s2334_s4 }
   0x2   :  { %11 = vst [vmem:[#allocation3] sm:$0x1] %v10_v0 }
   0x3   :  { %12 = vsyncpa [#allocation5], 0 }
   0x4   :  { %14 = vsyncpa [#allocation5 + $0x1], 0 }
   0x5   :  { %15 = vsyncpa [#allocation7], 0 }
   0x6   :  { %17 = vsyncpa [#allocation7 + $0x1], 0  ;;  %s2002_s20 = smov 0   ;;  %s2004_s21 = smov 0  }
   0x7   :  { %s2006_s22 = smov 0   ;;  %s2008_s23 = smov 0  }
   0x8   :  { %s2010_s24 = smov 0   ;;  %s2012_s25 = smov 0  }
   0x9 LB: > { %s1427_s4 = sadd.s32 4294967295, %s1962_s25   ;;  %s32_s26 = sadd.s32 1, %s1958_s24  ;;  %s1962_s25 = sphi %s2012_s25, %s23_s25   ;;  %s1958_s24 = sphi %s2010_s24, %s2348_s24   ;;  %s1954_s23 = sphi %s2008_s23, %s2347_s23   ;;  %s1950_s22 = sphi %s2006_s22, %s2346_s22   ;;  %s1946_s21 = sphi %s2004_s21, %s2345_s21   ;;  %s1942_s20 = sphi %s2002_s20, %s2344_s20  }
   0xa   : > { %p33_p0 = scmp.ge.s32.totalorder %s32_s26, 2  ;;  %s44_s27 = sadd.s32 1, %s1950_s22 }
   0xb   : > { %p51_p1 = scmp.ne.s32.totalorder %s1950_s22, %s1946_s21  ;;  %p52_p2 = scmp.eq.s32.totalorder %s1962_s25, 0 }
   0xc   : > { %s2350_s26 = smov (%p33_p0, %s32_s26), 0  ;;  %p57_p4 = scmp.ne.s32.totalorder %s1946_s21, %s1942_s20 }
   0xd   : > { %p2038_p3 = por %p52_p2, %p51_p1  ;;  %s40_s29 = ssub.s32 %s1958_s24, %s2350_s26 }
   0xe   : > { %p58_p5 = scmp.eq.s32.totalorder %s1427_s4, 0  ;;  %p42_p6 = scmp.eq.s32.totalorder %s40_s29, 0 }
   0xf   : > { %p1596_p8 = scmp.lt.s32.totalorder %s1962_s25, 2  ;;  %s2054_s7 = sand.u32 1, %s1950_s22  }
  0x10   : > { %p2045_p7 = por %p58_p5, %p57_p4  ;;  %s1582_s8 = sshll.u32 %s1958_s24, 9 }
  0x11   : > { %s2051_s6 = scalar_select %p42_p6, %s1950_s22, %s44_s27  }
  0x12   : > { %s2338_s30 = scalar_select %p2045_p7, 1, 0 }
  0x13   : > { %s1430_s9 = sshll.u32 %s2054_s7, 5  ;;  %s2061_s12 = scalar_lea.hbm %s2330_s0, %s1582_s8 }
  0x14   : > { %s209_s13 = scalar_lea.vmem [#allocation4], %s1430_s9  ;;  %p2065_p9 = pnand %p1596_p8, %p2038_p3 }
  0x15   : > { %s219_s14 = sshll.u32 %s209_s13, 4  ;;  %s206_s16 = scalar_lea.sflag [#allocation5], %s2054_s7  ;;  %s2069_s14 = int_to_ptr.vmem [resolvable:$true] %s219_s14 }
  0x16   : > { %s1848_s17 = scalar_lea.hbm %s2061_s12, 512  ;;  %p1850_p13 = pneg %p2065_p9 }
  0x17   : > { %p1849_p12 = scmp.ne.s32.totalorder %s2061_s12, %s1848_s17  ;;  %s1853_s20 = scalar_lea.hbm %s2330_s0, 1024 }
  0x18   : > { %p1854_p2 = scmp.lt.u32.totalorder %s2061_s12, %s2330_s0  ;;  %p1855_p3 = scmp.lt.u32.totalorder %s1853_s20, %s1848_s17 }
  0x19   : > { %p1851_p0 = pnand %p1850_p13, %p1849_p12  ;;  %p1857_p5 = scmp.lt.u32.totalorder %s1848_s17, %s2061_s12 }
  0x1a   : > { %p1856_p4 = por %p1855_p3, %p1854_p2 }
  0x1b   : > { %p1852_p1 = pneg %p1851_p0 }
  0x1c   : > { %p1858_p6 = por %p1857_p5, %p1856_p4 }
  0x1e   : > { %p1859_p8 = pnand %p1858_p6, %p1852_p1 }
  0x20   : > { %1862 = shalt.err (!%p1859_p8)
}
  0x21   : > { %s1863_s28 = scalar_lea.vmem %s2069_s14, 512  ;;  %s1964_s29 = smov [#allocation4]  }
  0x22   : > { %p1864_p12 = scmp.ne.s32.totalorder %s2069_s14, %s1863_s28  ;;  %s1868_s8 = sshll.u32 %s1964_s29, 4  ;;  %s1869_s8 = int_to_ptr.vmem [resolvable:$false] %s1868_s8 }
  0x23   : > { %s1870_s9 = scalar_lea.vmem %s1869_s8, 1024  ;;  %p1871_p11 = scmp.lt.s32.totalorder %s2069_s14, %s1869_s8 }
  0x24   : > { %p1866_p0 = pnand %p1864_p12, %p1850_p13  ;;  %p1872_p2 = scmp.lt.s32.totalorder %s1870_s9, %s1863_s28 }
  0x26   : > { %p1867_p10 = pneg %p1866_p0  ;;  %p1873_p3 = por %p1872_p2, %p1871_p11 }
  0x28   : > { %p1874_p4 = pnand %p1873_p3, %p1867_p10 }
  0x2a   : > { %1877 = shalt.err (!%p1874_p4)
}
  0x2b   : > { %1592 = dma.hbm_to_vmem [thread:$0]  (!%p2065_p9), %s2061_s12, 512, %s2069_s14, %s206_s16  }
  0x2c   : > { %p2340_p1 = scmp.lt.s32.totalorder %s1962_s25, 3  ;;  %p2341_p5 = scmp.ge.s32.totalorder %s1962_s25, 1 }
  0x2d   : > { %s1433_s11 = sshll.u32 %s2054_s7, 10  ;;  %s1584_s13 = sshll.u32 %s1958_s24, 14 }
  0x2e   : > { %p2103_p6 = pnand %p2341_p5, %p2340_p1  ;;  %s2112_s19 = scalar_lea.hbm %s2331_s1, %s1584_s13 }
  0x2f   : > { %s230_s20 = scalar_lea.vmem [#allocation6], %s1433_s11  ;;  %s227_s12 = scalar_lea.sflag [#allocation7], %s2054_s7 }
  0x30   : > { %s238_s4 = sshll.u32 %s230_s20, 4  ;;  %s1878_s14 = scalar_lea.hbm %s2112_s19, 16384  ;;  %s2114_s4 = int_to_ptr.vmem [resolvable:$true] %s238_s4 }
  0x31   : > { %p1879_p10 = scmp.ne.s32.totalorder %s2112_s19, %s1878_s14  ;;  %s1883_s28 = scalar_lea.hbm %s2331_s1, 32768 }
  0x32   : > { %p1884_p12 = scmp.lt.u32.totalorder %s2112_s19, %s2331_s1  ;;  %p1885_p0 = scmp.lt.u32.totalorder %s1883_s28, %s1878_s14 }
  0x33   : > { %p1881_p11 = pnand %p1879_p10, %p1850_p13  ;;  %p1887_p3 = scmp.lt.u32.totalorder %s1878_s14, %s2112_s19 }
  0x34   : > { %p1886_p2 = por %p1885_p0, %p1884_p12 }
  0x35   : > { %p1882_p8 = pneg %p1881_p11 }
  0x36   : > { %p1888_p4 = por %p1887_p3, %p1886_p2 }
  0x38   : > { %p1889_p1 = pnand %p1888_p4, %p1882_p8 }
  0x3a   : > { %1892 = shalt.err (!%p1889_p1)
}
  0x3b   : > { %s1893_s9 = scalar_lea.vmem %s2114_s4, 16384  ;;  %s1965_s11 = smov [#allocation6]  }
  0x3c   : > { %p1894_p5 = scmp.ne.s32.totalorder %s2114_s4, %s1893_s9  ;;  %s1898_s13 = sshll.u32 %s1965_s11, 4  ;;  %s1899_s13 = int_to_ptr.vmem [resolvable:$false] %s1898_s13 }
  0x3d   : > { %s1900_s17 = scalar_lea.vmem %s1899_s13, 32768  ;;  %p1901_p7 = scmp.lt.s32.totalorder %s2114_s4, %s1899_s13 }
  0x3e   : > { %p1896_p10 = pnand %p1894_p5, %p1850_p13  ;;  %p1902_p12 = scmp.lt.s32.totalorder %s1900_s17, %s1893_s9 }
  0x40   : > { %p1897_p11 = pneg %p1896_p10  ;;  %p1903_p0 = por %p1902_p12, %p1901_p7 }
  0x42   : > { %p1904_p2 = pnand %p1903_p0, %p1897_p11 }
  0x44   : > { %1907 = shalt.err (!%p1904_p2)
}
  0x45   : > { %s1966_s18 = smov 128   ;;  %s1967_s20 = smov 8  }
  0x46   : > { %1595 = dma.hbm_to_vmem [thread:$0]  (!%p2065_p9), %s2112_s19, 16384, %s2114_s4, %s227_s12, %s1966_s18, %s1966_s18, %s1967_s20  }
  0x47   : > { %250 = sbr.rel (%p2103_p6) target bundleno = 601 (0x259), region = 40  ;;  %s252_s14 = sand.u32 (!%p2103_p6), 1, %s1946_s21  }
  0x48   : > { %s1438_s16 = sshll.u32 (!%p2103_p6), %s252_s14, 5  ;;  %s253_s27 = scalar_lea.sflag (!%p2103_p6), [#allocation5], %s252_s14 }
  0x49   : > { %s2145_s28 = scalar_lea.vmem (!%p2103_p6), [#allocation4], %s1438_s16  ;;  %p2343_p7 = scmp.ne.s32.totalorder (!%p2103_p6), %s2338_s30, 0 }
  0x4e   : > { %1933 = dma.done.wait (%p2343_p7), %s253_s27, 512  }
  0x4f   : > { %1935 = vsyncadd (%p2343_p7), %s253_s27, 4294966784  ;;  %s1439_s29 = sshll.u32 %s252_s14, 10  ;;  %s262_s15 = scalar_lea.sflag [#allocation7], %s252_s14 }
  0x50   : > { %s2151_s7 = scalar_lea.vmem [#allocation6], %s1439_s29 }
  0x51   : > { %1937 = dma.done.wait (%p2343_p7), %s262_s15, 16384  }
  0x52   : > { %1939 = vsyncadd (%p2343_p7), %s262_s15, 4294950912  ;;  %p1440_p9 = scmp.ne.s32.totalorder %s1954_s23, 0 }
  0x53   : > { %v1968_v1 = vmov (!%p1440_p9), 0.0  }
  0x54   : > { %305 = sbr.rel (%p1440_p9) target bundleno = 91 (0x5b), region = 52  ;;  %306 = vst [vmem:[#allocation2] sm:$0xff] (!%p1440_p9), %v1968_v1  ;;  %307 = vst [vmem:[#allocation2 + $0x8] sm:$0xff] (!%p1440_p9), %v1968_v1 }
  0x5b PF: > { %v1648_v2 = vld [vmem:[%s2151_s7 + $0x4] ss:$8 sps:$4 sm:$0xff]   ;;  %v1652_v4 = vld [vmem:[%s2151_s7] ss:$8 sps:$4 sm:$0xff]   ;;  %v1654_v6 = vld [vmem:[%s2151_s7 + $0x14] ss:$8 sps:$4 sm:$0xff]  }
  0x5c   : > { %v1650_v3 = vld [vmem:[%s2151_s7 + $0x104] ss:$8 sps:$4 sm:$0xff]   ;;  %1110 = vmatprep.subr.bf16.mxu0 %v1648_v2  ;;  %v1653_v5 = vld [vmem:[%s2151_s7 + $0x100] ss:$8 sps:$4 sm:$0xff]   ;;  %v1656_v7 = vld [vmem:[%s2151_s7 + $0x114] ss:$8 sps:$4 sm:$0xff]  }
  0x5d   : > { %1151 = vmatprep.subr.bf16.mxu1 %v1650_v3  ;;  %1111 = vmatpush1.bf16.msra.mxu0 %v1652_v4  ;;  %v1658_v8 = vld [vmem:[%s2151_s7 + $0x10] ss:$8 sps:$4 sm:$0xff]   ;;  %v1660_v10 = vld [vmem:[%s2151_s7 + $0x24] ss:$8 sps:$4 sm:$0xff]   ;;  %v1664_v12 = vld [vmem:[%s2151_s7 + $0x20] ss:$8 sps:$4 sm:$0xff]  }
  0x5e   : > { %1152 = vmatpush1.bf16.msra.mxu1 %v1653_v5  ;;  %1112 = vmatprep.subr.bf16.mxu0 %v1654_v6  ;;  %v1659_v9 = vld [vmem:[%s2151_s7 + $0x110] ss:$8 sps:$4 sm:$0xff]   ;;  %v1662_v11 = vld [vmem:[%s2151_s7 + $0x124] ss:$8 sps:$4 sm:$0xff]   ;;  %v1665_v13 = vld [vmem:[%s2151_s7 + $0x120] ss:$8 sps:$4 sm:$0xff]  }
  0x5f   : > { %1153 = vmatprep.subr.bf16.mxu1 %v1656_v7  ;;  %v1666_v14 = vld [vmem:[%s2151_s7 + $0x34] ss:$8 sps:$4 sm:$0xff]   ;;  %v1670_v16 = vld [vmem:[%s2151_s7 + $0x30] ss:$8 sps:$4 sm:$0xff]   ;;  %v1672_v18 = vld [vmem:[%s2151_s7 + $0x44] ss:$8 sps:$4 sm:$0xff]  }
  0x60   : > { %v1668_v15 = vld [vmem:[%s2151_s7 + $0x134] ss:$8 sps:$4 sm:$0xff]   ;;  %v1671_v17 = vld [vmem:[%s2151_s7 + $0x130] ss:$8 sps:$4 sm:$0xff]   ;;  %v1674_v19 = vld [vmem:[%s2151_s7 + $0x144] ss:$8 sps:$4 sm:$0xff]  }
  0x61   : > { %1113 = vmatpush1.bf16.msra.mxu0 %v1658_v8  ;;  %v1676_v20 = vld [vmem:[%s2151_s7 + $0x40] ss:$8 sps:$4 sm:$0xff]   ;;  %v1678_v22 = vld [vmem:[%s2151_s7 + $0x54] ss:$8 sps:$4 sm:$0xff]   ;;  %v1682_v24 = vld [vmem:[%s2151_s7 + $0x50] ss:$8 sps:$4 sm:$0xff]  }
  0x62   : > { %1154 = vmatpush1.bf16.msra.mxu1 %v1659_v9  ;;  %1114 = vmatprep.subr.bf16.mxu0 %v1660_v10  ;;  %v1677_v21 = vld [vmem:[%s2151_s7 + $0x140] ss:$8 sps:$4 sm:$0xff]   ;;  %v1680_v23 = vld [vmem:[%s2151_s7 + $0x154] ss:$8 sps:$4 sm:$0xff]   ;;  %v1683_v25 = vld [vmem:[%s2151_s7 + $0x150] ss:$8 sps:$4 sm:$0xff]  }
  0x63   : > { %1155 = vmatprep.subr.bf16.mxu1 %v1662_v11  ;;  %v1684_v26 = vld [vmem:[%s2151_s7 + $0x64] ss:$8 sps:$4 sm:$0xff]   ;;  %v1688_v28 = vld [vmem:[%s2151_s7 + $0x60] ss:$8 sps:$4 sm:$0xff]   ;;  %v1690_v30 = vld [vmem:[%s2151_s7 + $0x74] ss:$8 sps:$4 sm:$0xff]  }
  0x64   : > { %v1686_v27 = vld [vmem:[%s2151_s7 + $0x164] ss:$8 sps:$4 sm:$0xff]   ;;  %v1689_v29 = vld [vmem:[%s2151_s7 + $0x160] ss:$8 sps:$4 sm:$0xff]   ;;  %v1692_v31 = vld [vmem:[%s2151_s7 + $0x174] ss:$8 sps:$4 sm:$0xff]  }
  0x65   : > { %1115 = vmatpush1.bf16.msra.mxu0 %v1664_v12  ;;  %v1694_v32 = vld [vmem:[%s2151_s7 + $0x70] ss:$8 sps:$4 sm:$0xff]   ;;  %v1696_v34 = vld [vmem:[%s2151_s7 + $0x84] ss:$8 sps:$4 sm:$0xff]   ;;  %v1700_v36 = vld [vmem:[%s2151_s7 + $0x80] ss:$8 sps:$4 sm:$0xff]  }
  0x66   : > { %1156 = vmatpush1.bf16.msra.mxu1 %v1665_v13  ;;  %1116 = vmatprep.subr.bf16.mxu0 %v1666_v14  ;;  %v1695_v33 = vld [vmem:[%s2151_s7 + $0x170] ss:$8 sps:$4 sm:$0xff]   ;;  %v1698_v35 = vld [vmem:[%s2151_s7 + $0x184] ss:$8 sps:$4 sm:$0xff]   ;;  %v1701_v37 = vld [vmem:[%s2151_s7 + $0x180] ss:$8 sps:$4 sm:$0xff]  }
  0x67   : > { %1157 = vmatprep.subr.bf16.mxu1 %v1668_v15  ;;  %v1702_v38 = vld [vmem:[%s2151_s7 + $0x94] ss:$8 sps:$4 sm:$0xff]   ;;  %v1706_v40 = vld [vmem:[%s2151_s7 + $0x90] ss:$8 sps:$4 sm:$0xff]   ;;  %v1708_v42 = vld [vmem:[%s2151_s7 + $0xa4] ss:$8 sps:$4 sm:$0xff]  }
  0x68   : > { %v1704_v39 = vld [vmem:[%s2151_s7 + $0x194] ss:$8 sps:$4 sm:$0xff]   ;;  %v1707_v41 = vld [vmem:[%s2151_s7 + $0x190] ss:$8 sps:$4 sm:$0xff]   ;;  %v1710_v43 = vld [vmem:[%s2151_s7 + $0x1a4] ss:$8 sps:$4 sm:$0xff]  }
  0x69   : > { %1117 = vmatpush1.bf16.msra.mxu0 %v1670_v16  ;;  %v1712_v44 = vld [vmem:[%s2151_s7 + $0xa0] ss:$8 sps:$4 sm:$0xff]   ;;  %v1714_v46 = vld [vmem:[%s2151_s7 + $0xb4] ss:$8 sps:$4 sm:$0xff]   ;;  %v1718_v51 = vld [vmem:[%s2151_s7 + $0xb0] ss:$8 sps:$4 sm:$0xff]  }
  0x6a   : > { %1158 = vmatpush1.bf16.msra.mxu1 %v1671_v17  ;;  %1118 = vmatprep.subr.bf16.mxu0 %v1672_v18  ;;  %v1713_v45 = vld [vmem:[%s2151_s7 + $0x1a0] ss:$8 sps:$4 sm:$0xff]   ;;  %v1716_v47 = vld [vmem:[%s2151_s7 + $0x1b4] ss:$8 sps:$4 sm:$0xff]   ;;  %v1719_v52 = vld [vmem:[%s2151_s7 + $0x1b0] ss:$8 sps:$4 sm:$0xff]  }
  0x6b   : > { %1159 = vmatprep.subr.bf16.mxu1 %v1674_v19  ;;  %v310_v48 = vld [vmem:[%s2145_s28] sm:$0xff]  ;;  %v311_v50 = vld [vmem:[%s2145_s28 + $0x8] sm:$0xff]  ;;  %v1726_v58 = vld [vmem:[%s2151_s7 + $0xd4] ss:$8 sps:$4 sm:$0xff]   ;;  %p1577_p13 = scmp.ne.s32.totalorder %s1954_s23, 1 }
  0x6c   : > { %v1442_v49 = vcombine.high %v310_v48, %v310_v48  ;;  %v1444_v53 = vcombine.high %v311_v50, %v311_v50  ;;  %v1720_v54 = vld [vmem:[%s2151_s7 + $0xc4] ss:$8 sps:$4 sm:$0xff]   ;;  %v1724_v56 = vld [vmem:[%s2151_s7 + $0xc0] ss:$8 sps:$4 sm:$0xff]   ;;  %v1728_v59 = vld [vmem:[%s2151_s7 + $0x1d4] ss:$8 sps:$4 sm:$0xff]   ;;  %v1441_v8 = vcombine.low %v310_v48, %v310_v48  ;;  %v1443_v9 = vcombine.low %v311_v50, %v311_v50 }
  0x6d   : > { %1119 = vmatpush1.bf16.msra.mxu0 %v1676_v20  ;;  %v1722_v55 = vld [vmem:[%s2151_s7 + $0x1c4] ss:$8 sps:$4 sm:$0xff]   ;;  %v1725_v57 = vld [vmem:[%s2151_s7 + $0x1c0] ss:$8 sps:$4 sm:$0xff]   ;;  %v1730_v60 = vld [vmem:[%s2151_s7 + $0xd0] ss:$8 sps:$4 sm:$0xff]  }
  0x6e   : > { %1160 = vmatpush1.bf16.msra.mxu1 %v1677_v21  ;;  %1120 = vmatprep.subr.bf16.mxu0 %v1678_v22  ;;  %v1731_v61 = vld [vmem:[%s2151_s7 + $0x1d0] ss:$8 sps:$4 sm:$0xff]   ;;  %v1732_v62 = vld [vmem:[%s2151_s7 + $0xe4] ss:$8 sps:$4 sm:$0xff]   ;;  %v1736_v0 = vld [vmem:[%s2151_s7 + $0xe0] ss:$8 sps:$4 sm:$0xff]  }
  0x6f   : > { %1161 = vmatprep.subr.bf16.mxu1 %v1680_v23  ;;  %1142 = vmatprep.mubr.bf16.mxu0 %v1442_v49  ;;  %v1734_v63 = vld [vmem:[%s2151_s7 + $0x1e4] ss:$8 sps:$4 sm:$0xff]   ;;  %v1737_v1 = vld [vmem:[%s2151_s7 + $0x1e0] ss:$8 sps:$4 sm:$0xff]   ;;  %v1738_v2 = vld [vmem:[%s2151_s7 + $0xf4] ss:$8 sps:$4 sm:$0xff]  }
  0x70   : > { %1183 = vmatprep.mubr.bf16.mxu1 %v1444_v53  ;;  %v1740_v3 = vld [vmem:[%s2151_s7 + $0x1f4] ss:$8 sps:$4 sm:$0xff]   ;;  %v1742_v4 = vld [vmem:[%s2151_s7 + $0xf0] ss:$8 sps:$4 sm:$0xff]   ;;  %v1750_v6 = vld [vmem:[%s2151_s7 + $0x204] ss:$8 sps:$4 sm:$0xff]  }
  0x71   : > { %1121 = vmatpush1.bf16.msra.mxu0 %v1682_v24  ;;  %v1743_v5 = vld [vmem:[%s2151_s7 + $0x1f0] ss:$8 sps:$4 sm:$0xff]   ;;  %v1753_v7 = vld [vmem:[%s2151_s7 + $0x304] ss:$8 sps:$4 sm:$0xff]   ;;  %v1748_v10 = vld [vmem:[%s2151_s7 + $0x200] ss:$8 sps:$4 sm:$0xff]  }
  0x72   : > { %1162 = vmatpush1.bf16.msra.mxu1 %v1683_v25  ;;  %1122 = vmatprep.subr.bf16.mxu0 %v1684_v26  ;;  %v1751_v11 = vld [vmem:[%s2151_s7 + $0x300] ss:$8 sps:$4 sm:$0xff]   ;;  %v1756_v12 = vld [vmem:[%s2151_s7 + $0x214] ss:$8 sps:$4 sm:$0xff]   ;;  %v1754_v14 = vld [vmem:[%s2151_s7 + $0x210] ss:$8 sps:$4 sm:$0xff]  }
  0x73   : > { %1163 = vmatprep.subr.bf16.mxu1 %v1686_v27  ;;  %v1759_v13 = vld [vmem:[%s2151_s7 + $0x314] ss:$8 sps:$4 sm:$0xff]   ;;  %v1757_v15 = vld [vmem:[%s2151_s7 + $0x310] ss:$8 sps:$4 sm:$0xff]   ;;  %v1762_v16 = vld [vmem:[%s2151_s7 + $0x224] ss:$8 sps:$4 sm:$0xff]  }
  0x74   : > { %v1765_v17 = vld [vmem:[%s2151_s7 + $0x324] ss:$8 sps:$4 sm:$0xff]   ;;  %v1760_v18 = vld [vmem:[%s2151_s7 + $0x220] ss:$8 sps:$4 sm:$0xff]   ;;  %v1768_v20 = vld [vmem:[%s2151_s7 + $0x234] ss:$8 sps:$4 sm:$0xff]  }
  0x75   : > { %1123 = vmatpush1.bf16.msra.mxu0 %v1688_v28  ;;  %v1763_v19 = vld [vmem:[%s2151_s7 + $0x320] ss:$8 sps:$4 sm:$0xff]   ;;  %v1771_v21 = vld [vmem:[%s2151_s7 + $0x334] ss:$8 sps:$4 sm:$0xff]   ;;  %v1766_v22 = vld [vmem:[%s2151_s7 + $0x230] ss:$8 sps:$4 sm:$0xff]  }
  0x76   : > { %1164 = vmatpush1.bf16.msra.mxu1 %v1689_v29  ;;  %1124 = vmatprep.subr.bf16.mxu0 %v1690_v30  ;;  %v1769_v23 = vld [vmem:[%s2151_s7 + $0x330] ss:$8 sps:$4 sm:$0xff]   ;;  %v1774_v24 = vld [vmem:[%s2151_s7 + $0x244] ss:$8 sps:$4 sm:$0xff]   ;;  %v1772_v26 = vld [vmem:[%s2151_s7 + $0x240] ss:$8 sps:$4 sm:$0xff]  }
  0x77   : > { %1165 = vmatprep.subr.bf16.mxu1 %v1692_v31  ;;  %v1777_v25 = vld [vmem:[%s2151_s7 + $0x344] ss:$8 sps:$4 sm:$0xff]   ;;  %v1775_v27 = vld [vmem:[%s2151_s7 + $0x340] ss:$8 sps:$4 sm:$0xff]   ;;  %v1780_v28 = vld [vmem:[%s2151_s7 + $0x254] ss:$8 sps:$4 sm:$0xff]  }
  0x78   : > { %v1783_v29 = vld [vmem:[%s2151_s7 + $0x354] ss:$8 sps:$4 sm:$0xff]   ;;  %v1778_v30 = vld [vmem:[%s2151_s7 + $0x250] ss:$8 sps:$4 sm:$0xff]   ;;  %v1813_v53 = vld [vmem:[%s2151_s7 + $0x3a4] ss:$8 sps:$4 sm:$0xff]  }
  0x79   : > { %1125 = vmatpush1.bf16.msra.mxu0 %v1694_v32  ;;  %v1781_v31 = vld [vmem:[%s2151_s7 + $0x350] ss:$8 sps:$4 sm:$0xff]   ;;  %v1786_v32 = vld [vmem:[%s2151_s7 + $0x264] ss:$8 sps:$4 sm:$0xff]   ;;  %v1804_v48 = vld [vmem:[%s2151_s7 + $0x294] ss:$8 sps:$4 sm:$0xff]  }
  0x7a   : > { %1166 = vmatpush1.bf16.msra.mxu1 %v1695_v33  ;;  %1126 = vmatprep.subr.bf16.mxu0 %v1696_v34  ;;  %v1789_v33 = vld [vmem:[%s2151_s7 + $0x364] ss:$8 sps:$4 sm:$0xff]   ;;  %v2251_v34 = vld [vmem:[%s2145_s28 + $0x10] sm:$0xff]  ;;  %vm1329_vm2 = vcmask (!%p1577_p13), 7168  }
  0x7b   : > { %1167 = vmatprep.subr.bf16.mxu1 %v1698_v35  ;;  %v2254_v35 = vld [vmem:[%s2145_s28 + $0x18] sm:$0xff] }
  0x7c   : > { %v1807_v49 = vld [vmem:[%s2151_s7 + $0x394] ss:$8 sps:$4 sm:$0xff]   ;;  %v1802_v50 = vld [vmem:[%s2151_s7 + $0x290] ss:$8 sps:$4 sm:$0xff]  }
  0x7d   : > { %1127 = vmatpush1.bf16.msra.mxu0 %v1700_v36  ;;  %v1446_v36 = vcombine.high %v2251_v34, %v2251_v34 }
  0x7e   : > { %1168 = vmatpush1.bf16.msra.mxu1 %v1701_v37  ;;  %1128 = vmatprep.subr.bf16.mxu0 %v1702_v38  ;;  %v1448_v37 = vcombine.high %v2254_v35, %v2254_v35  ;;  %v1784_v38 = vld [vmem:[%s2151_s7 + $0x260] ss:$8 sps:$4 sm:$0xff]  }
  0x7f   : > { %1169 = vmatprep.subr.bf16.mxu1 %v1704_v39  ;;  %v1787_v39 = vld [vmem:[%s2151_s7 + $0x360] ss:$8 sps:$4 sm:$0xff]  }
  0x81   : > { %1129 = vmatpush1.bf16.msra.mxu0 %v1706_v40  ;;  %v1792_v40 = vld [vmem:[%s2151_s7 + $0x274] ss:$8 sps:$4 sm:$0xff]  }
  0x82   : > { %1170 = vmatpush1.bf16.msra.mxu1 %v1707_v41  ;;  %1130 = vmatprep.subr.bf16.mxu0 %v1708_v42  ;;  %v1795_v41 = vld [vmem:[%s2151_s7 + $0x374] ss:$8 sps:$4 sm:$0xff]   ;;  %v1790_v42 = vld [vmem:[%s2151_s7 + $0x270] ss:$8 sps:$4 sm:$0xff]  }
  0x83   : > { %1171 = vmatprep.subr.bf16.mxu1 %v1710_v43  ;;  %v1793_v43 = vld [vmem:[%s2151_s7 + $0x370] ss:$8 sps:$4 sm:$0xff]  }
  0x85   : > { %1131 = vmatpush1.bf16.msra.mxu0 %v1712_v44  ;;  %v1798_v44 = vld [vmem:[%s2151_s7 + $0x284] ss:$8 sps:$4 sm:$0xff]  }
  0x86   : > { %1172 = vmatpush1.bf16.msra.mxu1 %v1713_v45  ;;  %1132 = vmatprep.subr.bf16.mxu0 %v1714_v46  ;;  %v1801_v45 = vld [vmem:[%s2151_s7 + $0x384] ss:$8 sps:$4 sm:$0xff]   ;;  %v1796_v46 = vld [vmem:[%s2151_s7 + $0x280] ss:$8 sps:$4 sm:$0xff]  }
  0x87   : > { %1173 = vmatprep.subr.bf16.mxu1 %v1716_v47  ;;  %v1799_v47 = vld [vmem:[%s2151_s7 + $0x380] ss:$8 sps:$4 sm:$0xff]  }
  0x89   : > { %1133 = vmatpush1.bf16.msra.mxu0 %v1718_v51  ;;  %v1805_v51 = vld [vmem:[%s2151_s7 + $0x390] ss:$8 sps:$4 sm:$0xff]  }
  0x8a   : > { %1174 = vmatpush1.bf16.msra.mxu1 %v1719_v52  ;;  %1134 = vmatprep.subr.bf16.mxu0 %v1720_v54  ;;  %v1810_v52 = vld [vmem:[%s2151_s7 + $0x2a4] ss:$8 sps:$4 sm:$0xff]   ;;  %v1808_v54 = vld [vmem:[%s2151_s7 + $0x2a0] ss:$8 sps:$4 sm:$0xff]  }
  0x8b   : > { %1175 = vmatprep.subr.bf16.mxu1 %v1722_v55  ;;  %v1811_v55 = vld [vmem:[%s2151_s7 + $0x3a0] ss:$8 sps:$4 sm:$0xff]  }
  0x8d   : > { %1135 = vmatpush1.bf16.msra.mxu0 %v1724_v56  ;;  %v1816_v56 = vld [vmem:[%s2151_s7 + $0x2b4] ss:$8 sps:$4 sm:$0xff]  }
  0x8e   : > { %1176 = vmatpush1.bf16.msra.mxu1 %v1725_v57  ;;  %1136 = vmatprep.subr.bf16.mxu0 %v1726_v58  ;;  %v1819_v57 = vld [vmem:[%s2151_s7 + $0x3b4] ss:$8 sps:$4 sm:$0xff]   ;;  %v1814_v58 = vld [vmem:[%s2151_s7 + $0x2b0] ss:$8 sps:$4 sm:$0xff]  }
  0x8f   : > { %1177 = vmatprep.subr.bf16.mxu1 %v1728_v59  ;;  %v1817_v59 = vld [vmem:[%s2151_s7 + $0x3b0] ss:$8 sps:$4 sm:$0xff]  }
  0x91   : > { %1137 = vmatpush1.bf16.msra.mxu0 %v1730_v60  ;;  %v1822_v60 = vld [vmem:[%s2151_s7 + $0x2c4] ss:$8 sps:$4 sm:$0xff]  }
  0x92   : > { %1178 = vmatpush1.bf16.msra.mxu1 %v1731_v61  ;;  %1138 = vmatprep.subr.bf16.mxu0 %v1732_v62  ;;  %v1825_v61 = vld [vmem:[%s2151_s7 + $0x3c4] ss:$8 sps:$4 sm:$0xff]   ;;  %v1820_v62 = vld [vmem:[%s2151_s7 + $0x2c0] ss:$8 sps:$4 sm:$0xff]  }
  0x93   : > { %1179 = vmatprep.subr.bf16.mxu1 %v1734_v63  ;;  %v1823_v63 = vld [vmem:[%s2151_s7 + $0x3c0] ss:$8 sps:$4 sm:$0xff]  }
  0x95   : > { %1139 = vmatpush1.bf16.msra.mxu0 %v1736_v0  ;;  %v1828_v0 = vld [vmem:[%s2151_s7 + $0x2d4] ss:$8 sps:$4 sm:$0xff]  }
  0x96   : > { %1180 = vmatpush1.bf16.msra.mxu1 %v1737_v1  ;;  %1140 = vmatprep.subr.bf16.mxu0 %v1738_v2  ;;  %v1831_v1 = vld [vmem:[%s2151_s7 + $0x3d4] ss:$8 sps:$4 sm:$0xff]   ;;  %v1826_v2 = vld [vmem:[%s2151_s7 + $0x2d0] ss:$8 sps:$4 sm:$0xff]  }
  0x97   : > { %1181 = vmatprep.subr.bf16.mxu1 %v1740_v3  ;;  %v1829_v3 = vld [vmem:[%s2151_s7 + $0x3d0] ss:$8 sps:$4 sm:$0xff]  }
  0x99   : > { %1141 = vmatpush1.bf16.msra.mxu0 %v1742_v4  ;;  %v1834_v4 = vld [vmem:[%s2151_s7 + $0x2e4] ss:$8 sps:$4 sm:$0xff]  }
  0x9a   : > { %1182 = vmatpush1.bf16.msra.mxu1 %v1743_v5  ;;  %1192 = vmatprep.subr.bf16.mxu0 %v1750_v6  ;;  %v1837_v5 = vld [vmem:[%s2151_s7 + $0x3e4] ss:$8 sps:$4 sm:$0xff]   ;;  %v1832_v6 = vld [vmem:[%s2151_s7 + $0x2e0] ss:$8 sps:$4 sm:$0xff]  }
  0x9b   : > { %1233 = vmatprep.subr.bf16.mxu1 %v1753_v7  ;;  %v1835_v7 = vld [vmem:[%s2151_s7 + $0x3e0] ss:$8 sps:$4 sm:$0xff]  }
  0x9c   : > { %1143 = vmatmul.mubr.bf16.vlgmr.msra.gmra.mrb[0].mxu0 %v1441_v8  ;;  %v1840_v8 = vld [vmem:[%s2151_s7 + $0x2f4] ss:$8 sps:$4 sm:$0xff]  }
  0x9d   : > { %1184 = vmatmul.mubr.bf16.vlgmr.msra.gmra.mrb[0].mxu1 %v1443_v9  ;;  %1193 = vmatpush1.bf16.msra.mxu0 %v1748_v10  ;;  %v1843_v9 = vld [vmem:[%s2151_s7 + $0x3f4] ss:$8 sps:$4 sm:$0xff]   ;;  %v1838_v10 = vld [vmem:[%s2151_s7 + $0x2f0] ss:$8 sps:$4 sm:$0xff]  }
  0x9e   : > { %1234 = vmatpush1.bf16.msra.mxu1 %v1751_v11  ;;  %1194 = vmatprep.subr.bf16.mxu0 %v1756_v12  ;;  %v1841_v11 = vld [vmem:[%s2151_s7 + $0x3f0] ss:$8 sps:$4 sm:$0xff]   ;;  %v1445_v12 = vcombine.low %v2251_v34, %v2251_v34 }
  0x9f   : > { %1235 = vmatprep.subr.bf16.mxu1 %v1759_v13  ;;  %1224 = vmatprep.mubr.bf16.mxu0 %v1446_v36  ;;  %v1447_v13 = vcombine.low %v2254_v35, %v2254_v35  ;;  %v309_v34 = vld [vmem:[#allocation2 + $0x8] sm:$0xff] }
  0xa0   : > { %1265 = vmatprep.mubr.bf16.mxu1 %v1448_v37 }
  0xa1   : > { %1195 = vmatpush1.bf16.msra.mxu0 %v1754_v14 }
  0xa2   : > { %1236 = vmatpush1.bf16.msra.mxu1 %v1757_v15  ;;  %1196 = vmatprep.subr.bf16.mxu0 %v1762_v16 }
  0xa3   : > { %1237 = vmatprep.subr.bf16.mxu1 %v1765_v17 }
  0xa5   : > { %1197 = vmatpush1.bf16.msra.mxu0 %v1760_v18 }
  0xa6   : > { %1238 = vmatpush1.bf16.msra.mxu1 %v1763_v19  ;;  %1198 = vmatprep.subr.bf16.mxu0 %v1768_v20 }
  0xa7   : > { %1239 = vmatprep.subr.bf16.mxu1 %v1771_v21 }
  0xa9   : > { %1199 = vmatpush1.bf16.msra.mxu0 %v1766_v22 }
  0xaa   : > { %1240 = vmatpush1.bf16.msra.mxu1 %v1769_v23  ;;  %1200 = vmatprep.subr.bf16.mxu0 %v1774_v24 }
  0xab   : > { %1241 = vmatprep.subr.bf16.mxu1 %v1777_v25 }
  0xad   : > { %1201 = vmatpush1.bf16.msra.mxu0 %v1772_v26 }
  0xae   : > { %1242 = vmatpush1.bf16.msra.mxu1 %v1775_v27  ;;  %1202 = vmatprep.subr.bf16.mxu0 %v1780_v28 }
  0xaf   : > { %1243 = vmatprep.subr.bf16.mxu1 %v1783_v29  ;;  %v308_v29 = vld [vmem:[#allocation2] sm:$0xff] }
  0xb1   : > { %1203 = vmatpush1.bf16.msra.mxu0 %v1778_v30 }
  0xb2   : > { %1244 = vmatpush1.bf16.msra.mxu1 %v1781_v31  ;;  %1204 = vmatprep.subr.bf16.mxu0 %v1786_v32 }
  0xb3   : > { %1245 = vmatprep.subr.bf16.mxu1 %v1789_v33 }
  0xb5   : > { %1205 = vmatpush1.bf16.msra.mxu0 %v1784_v38 }
  0xb6   : > { %1246 = vmatpush1.bf16.msra.mxu1 %v1787_v39  ;;  %1206 = vmatprep.subr.bf16.mxu0 %v1792_v40  ;;  %v1286_v40 = vlaneseq (!%p1577_p13) }
  0xb7   : > { %1247 = vmatprep.subr.bf16.mxu1 %v1795_v41 }
  0xb8   : > { %v1287_v41 = vshrl.u32 (!%p1577_p13), %v1286_v40, 7 }
  0xb9   : > { %1207 = vmatpush1.bf16.msra.mxu0 %v1790_v42  ;;  %v1284_v42 = vld [vmem:[%s2332_s2] sm:$0x3] (!%p1577_p13) }
  0xba   : > { %1248 = vmatpush1.bf16.msra.mxu1 %v1793_v43  ;;  %1208 = vmatprep.subr.bf16.mxu0 %v1798_v44  ;;  %v1288_v43 = vsub.s32 (!%p1577_p13), 0, %v1287_v41  ;;  %v1292_v44 = vsub.s32 (!%p1577_p13), 1, %v1287_v41 }
  0xbb   : > { %1249 = vmatprep.subr.bf16.mxu1 %v1801_v45 }
  0xbd   : > { %1209 = vmatpush1.bf16.msra.mxu0 %v1796_v46 }
  0xbe   : > { %1250 = vmatpush1.bf16.msra.mxu1 %v1799_v47  ;;  %1210 = vmatprep.subr.bf16.mxu0 %v1804_v48  ;;  %v1289_v47 = vrot.slane (!%p1577_p13), %v1284_v42, %v1288_v43  ;;  %v1293_v48 = vrot.slane (!%p1577_p13), %v1284_v42, %v1292_v44 }
  0xbf   : > { %1251 = vmatprep.subr.bf16.mxu1 %v1807_v49  ;;  %v1304_v49 = vld [vmem:[%s2333_s3] sm:$0x3] (!%p1577_p13) }
  0xc1   : > { %1211 = vmatpush1.bf16.msra.mxu0 %v1802_v50 }
  0xc2   : > { %1252 = vmatpush1.bf16.msra.mxu1 %v1805_v51  ;;  %1212 = vmatprep.subr.bf16.mxu0 %v1810_v52  ;;  %v1309_v52 = vrot.slane (!%p1577_p13), %v1304_v49, %v1288_v43 }
  0xc3   : > { %1253 = vmatprep.subr.bf16.mxu1 %v1813_v53  ;;  %v1313_v53 = vrot.slane (!%p1577_p13), %v1304_v49, %v1292_v44 }
  0xc5   : > { %1213 = vmatpush1.bf16.msra.mxu0 %v1808_v54 }
  0xc6   : > { %1254 = vmatpush1.bf16.msra.mxu1 %v1811_v55  ;;  %1214 = vmatprep.subr.bf16.mxu0 %v1816_v56 }
  0xc7   : > { %1255 = vmatprep.subr.bf16.mxu1 %v1819_v57 }
  0xc9   : > { %1215 = vmatpush1.bf16.msra.mxu0 %v1814_v58 }
  0xca   : > { %1256 = vmatpush1.bf16.msra.mxu1 %v1817_v59  ;;  %1216 = vmatprep.subr.bf16.mxu0 %v1822_v60 }
  0xcb   : > { %1257 = vmatprep.subr.bf16.mxu1 %v1825_v61  ;;  %v1578_v61 = vld [vmem:[#allocation3] ss:$0 sm:$0xff] (!%p1577_p13) }
  0xcd   : > { %1217 = vmatpush1.bf16.msra.mxu0 %v1820_v62 }
  0xce   : > { %1258 = vmatpush1.bf16.msra.mxu1 %v1823_v63  ;;  %1218 = vmatprep.subr.bf16.mxu0 %v1828_v0 }
  0xcf   : > { %1259 = vmatprep.subr.bf16.mxu1 %v1831_v1 }
  0xd1   : > { %1219 = vmatpush1.bf16.msra.mxu0 %v1826_v2 }
  0xd2   : > { %1260 = vmatpush1.bf16.msra.mxu1 %v1829_v3  ;;  %1220 = vmatprep.subr.bf16.mxu0 %v1834_v4 }
  0xd3   : > { %1261 = vmatprep.subr.bf16.mxu1 %v1837_v5 }
  0xd5   : > { %1221 = vmatpush1.bf16.msra.mxu0 %v1832_v6 }
  0xd6   : > { %1262 = vmatpush1.bf16.msra.mxu1 %v1835_v7  ;;  %1222 = vmatprep.subr.bf16.mxu0 %v1840_v8 }
  0xd7   : > { %1263 = vmatprep.subr.bf16.mxu1 %v1843_v9 }
  0xd9   : > { %1223 = vmatpush1.bf16.msra.mxu0 %v1838_v10 }
  0xda   : > { %1264 = vmatpush1.bf16.msra.mxu1 %v1841_v11 }
  0xdc   : > { %1225 = vmatmul.mubr.bf16.vlgmr.msra.gmra.mrb[4].mxu0 %v1445_v12 }
  0xdd   : > { %1266 = vmatmul.mubr.bf16.vlgmr.msra.gmra.mrb[4].mxu1 %v1447_v13 }
 0x16f   : > { %v1144_v14 = vpop.f32.mrb[0].mxu0 }
 0x170   : > { %v1185_v15 = vpop.f32.mrb[0].mxu1  ;;  %v1146_v17 = vpop.f32.mrb[1].mxu0 }
 0x171   : > { %v1186_v16 = vadd.f32 %v1185_v15, %v1144_v14  ;;  %v1187_v18 = vpop.f32.mrb[1].mxu1  ;;  %v1148_v20 = vpop.f32.mrb[2].mxu0 }
 0x172   : > { %v1188_v19 = vadd.f32 %v1187_v18, %v1146_v17  ;;  %v1189_v21 = vpop.f32.mrb[2].mxu1  ;;  %v1149_v22 = vpop.f32.mrb[3].mxu0 }
 0x173   : > { %v1190_v23 = vpop.f32.mrb[3].mxu1 }
 0x1af   : > { %v1226_v24 = vpop.f32.mrb[4].mxu0 }
 0x1b0   : > { %v1267_v25 = vpop.f32.mrb[4].mxu1  ;;  %v1227_v26 = vadd.f32 %v1226_v24, %v1186_v16  ;;  %v1228_v27 = vpop.f32.mrb[5].mxu0 }
 0x1b1   : > { %v1269_v28 = vpop.f32.mrb[5].mxu1  ;;  %v1229_v30 = vadd.f32 %v1228_v27, %v1188_v19  ;;  %v1230_v31 = vpop.f32.mrb[6].mxu0  ;;  %1281 = sbr.rel (%p1577_p13) target bundleno = 601 (0x259), region = 56 }
 0x1b2   : > { %v1271_v32 = vpop.f32.mrb[6].mxu1  ;;  %v1268_v33 = vadd.f32 %v1267_v25, %v1227_v26  ;;  %v1231_v35 = vpop.f32.mrb[7].mxu0 }
 0x1b3   : > { %v1272_v36 = vpop.f32.mrb[7].mxu1  ;;  %v1270_v37 = vadd.f32 %v1269_v28, %v1229_v30 }
 0x1b4   : > { %v1274_v38 = vadd.f32 %v1268_v33, %v308_v29 }
 0x1b5   : > { %v1275_v39 = vadd.f32 %v1270_v37, %v309_v34 }
 0x1b6   : > { %1276 = vst [vmem:[#allocation2] sm:$0xff] %v1274_v38 }
 0x1b7   : > { %1277 = vst [vmem:[#allocation2 + $0x8] sm:$0xff] %v1275_v39 }
 0x1bd   : > { %v1282_v45 = vld [vmem:[#allocation2] sm:$0xff] }
 0x1be   : > { %v1283_v46 = vld [vmem:[#allocation2 + $0x8] sm:$0xff]  ;;  %v1296_v50 = vadd.f32 %v1289_v47, %v1282_v45 }
 0x1bf   : > { %v1297_v51 = vadd.f32 %v1293_v48, %v1283_v46 }
 0x1c0   : > { %vm1298_vm0 = vcmp.gt.f32.partialorder %v1296_v50, 0.0  ;;  %v1300_v54 = vmul.f32 0.01, %v1296_v50 }
 0x1c1   : > { %vm1299_vm1 = vcmp.gt.f32.partialorder %v1297_v51, 0.0  ;;  %v1301_v55 = vmul.f32 0.01, %v1297_v51 }
 0x1c2   : > { %v1302_v56 = vsel %vm1298_vm0, %v1296_v50, %v1300_v54 }
 0x1c3   : > { %v1303_v57 = vsel %vm1299_vm1, %v1297_v51, %v1301_v55  ;;  %v1316_v58 = vmul.f32 %v1309_v52, %v1302_v56 }
 0x1c4   : > { %v1317_v59 = vmul.f32 %v1313_v53, %v1303_v57 }
 0x1c6   : > { %v1318_v60 = vadd.f32 %v1317_v59, %v1316_v58 }
 0x1c8   : > { %1319 = vadd.xlane.f32.xlu0 %v1318_v60 }
 0x255   : > { %v1320_v62 = vpop.xlane.xlu0 %1319 }
 0x256   : > { %v1328_v63 = vadd.f32 %v1578_v61, %v1320_v62 }
 0x258   : > { %1330 = vst.msk [vmem:[%s2335_s5] sm:$0xff] %vm1329_vm2, %v1328_v63 }
 0x259 PF: > { %s23_s25 = sadd.s32 1, %s1962_s25   ;;  %s2344_s20 = smov %s1946_s21 }
 0x25a   : > { %p20_p6 = scmp.ge.s32.totalorder %s23_s25, 4   ;;  %s2345_s21 = smov %s1950_s22 }
 0x25b   : > { %s2346_s22 = smov %s2051_s6  ;;  %s2347_s23 = smov %s1958_s24 }
 0x25c   : > { %s2348_s24 = smov %s2350_s26  ;;  %22 = sbr.rel (!%p20_p6) target bundleno = 9 (0x9), region = 101 }
 0x263   :  { %1350 = vsyncpa [#allocation5], 1 }
 0x264   :  { %1352 = vsyncpa [#allocation5 + $0x1], 1 }
 0x265   :  { %1353 = vsyncpa [#allocation7], 1 }
 0x266   :  { %1355 = vsyncpa [#allocation7 + $0x1], 1 }

</bundles_post_ra>
